<compile_context>
chip_gen: v7x
topology: tpu7x:2x2x1
jax: 0.10.0
libtpu: 0.0.40
codegen_flags: <defaults>
</compile_context>

<pallas_src>
import jax
import jax.numpy as jnp
from jax.experimental import pallas as pl
from jax.experimental.pallas import tpu as pltpu


def _edge_inital_kernel(x_ref, g_ref, w12_ref, bi_ref, bo_ref, o_ref):
    # x_ref : (Bt, N, Din)   g_ref : (Bt, N, N)
    # w12_ref: (Din, D)      bi_ref: (1, D)   (= b1 @ W2)
    # bo_ref : (1, D)        (= b2)
    # o_ref : (Bt, N, D)
    bt, n, din = x_ref.shape
    d = o_ref.shape[-1]

    x = x_ref[...].astype(jnp.float32)        # (Bt, N, Din)
    g = g_ref[...].astype(jnp.float32)        # (Bt, N, N)

    # Fused first+second projection on the VPU (K = Din is tiny, so an MXU
    # matmul would waste almost the whole systolic depth).
    emb = jnp.broadcast_to(bi_ref[...].reshape(1, 1, d), (bt, n, d))
    for k in range(din):                      # static unroll, Din is small
        emb = emb + x[:, :, k:k + 1] * w12_ref[k:k + 1, :].reshape(1, 1, d)

    # Row-normalized aggregation: (G @ emb) / rowsum(G).
    div = jnp.sum(g, axis=-1, keepdims=True)                  # (Bt, N, 1)
    inv = pl.reciprocal(div, approx=True)                     # EUP slot
    agg = jnp.einsum('bnk,bkd->bnd', g, emb,
                     preferred_element_type=jnp.float32) * inv

    o_ref[...] = (agg + bo_ref[...].reshape(1, 1, d)).astype(o_ref.dtype)


def _pick_block_batches(B, N, Din, D, budget_bytes=6 * 1024 * 1024):
    """Largest divisor of B whose double-buffered VMEM footprint fits budget."""
    def pad(a, m):
        return ((a + m - 1) // m) * m
    per_batch = 4 * pad(N, 8) * (pad(Din, 128) + pad(N, 128) + 2 * pad(D, 128))
    per_batch *= 2  # input/output blocks are double-buffered
    cap = max(1, budget_bytes // max(per_batch, 1))
    for bt in range(min(B, cap), 0, -1):
        if B % bt == 0:
            return bt
    return 1


def edge_inital_forward(x, G, w1, b1, w2, b2):
    """x: [B, N, Din], G: [B, N, N], w1: [Din, D], b1: [D], w2: [D, D], b2: [D]."""
    assert x.ndim == 3
    B, N, Din = x.shape
    D = w1.shape[1]

    # Algebraic fusion of the two Linears (done once, outside the kernel).
    w12 = jnp.dot(w1.astype(jnp.float32), w2.astype(jnp.float32))     # (Din, D)
    bi = jnp.dot(b1.astype(jnp.float32), w2.astype(jnp.float32))      # (D,)
    bi = bi.reshape(1, D)
    bo = b2.astype(jnp.float32).reshape(1, D)

    bt = _pick_block_batches(B, N, Din, D)
    grid = B // bt

    out = pl.pallas_call(
        _edge_inital_kernel,
        out_shape=jax.ShapeDtypeStruct((B, N, D), jnp.float32),
        grid_spec=pltpu.PrefetchScalarGridSpec(
            num_scalar_prefetch=0,
            grid=(grid,),
            in_specs=[
                pl.BlockSpec((bt, N, Din), lambda b: (b, 0, 0)),
                pl.BlockSpec((bt, N, N), lambda b: (b, 0, 0)),
                pl.BlockSpec((Din, D), lambda b: (0, 0)),
                pl.BlockSpec((1, D), lambda b: (0, 0)),
                pl.BlockSpec((1, D), lambda b: (0, 0)),
            ],
            out_specs=pl.BlockSpec((bt, N, D), lambda b: (b, 0, 0)),
        ),
        compiler_params=pltpu.CompilerParams(
            dimension_semantics=("parallel",)),
    )(x, G, w12, bi, bo)

    # unsqueeze(1).repeat(1, 4, 1, 1) as a lazy wrapper-side broadcast.
    return jnp.broadcast_to(out[:, None], (B, 4, N, D))


def edge_inital_reference(x, G, w1, b1, w2, b2):
    emb = x @ w1 + b1
    div = jnp.sum(G, axis=-1, keepdims=True)
    out = ((G @ emb) / div) @ w2 + b2
    return jnp.broadcast_to(out[:, None], (x.shape[0], 4) + out.shape[1:])


if __name__ == "__main__":
    in_dims = 2
    d_model = 64
    D = d_model // 4  # 16
    B, N = 2, 8

    key = jax.random.PRNGKey(0)
    kx, kg, kw1, kb1, kw2, kb2 = jax.random.split(key, 6)

    x = jax.random.normal(kx, (B, N, in_dims), dtype=jnp.float32)
    # Positive adjacency so row sums are non-zero (matches div denominator use).
    G = jax.random.uniform(kg, (B, N, N), dtype=jnp.float32, minval=0.1, maxval=1.0)

    # Deterministic synthetic parameters (Linear weights stored as [in, out]).
    w1 = jax.random.normal(kw1, (in_dims, D), dtype=jnp.float32) * 0.1
    b1 = jax.random.normal(kb1, (D,), dtype=jnp.float32) * 0.1
    w2 = jax.random.normal(kw2, (D, D), dtype=jnp.float32) * 0.1
    b2 = jax.random.normal(kb2, (D,), dtype=jnp.float32) * 0.1

    out = edge_inital_forward(x, G, w1, b1, w2, b2)
    out = jax.block_until_ready(out)

    ref = edge_inital_reference(x, G, w1, b1, w2, b2)
    assert out.shape == (B, 4, N, D)
    # Slightly relaxed tolerance: W1@W2 pre-fusion + approx EUP reciprocal
    # change f32 rounding a little vs. the literal op order.
    assert jnp.allclose(out, ref, atol=1e-3, rtol=1e-3)

    print("KERNEL_OK")
</pallas_src>

<mosaic_0001>
module attributes {stable_mosaic.version = 11 : i64} {
  func.func @_edge_inital_kernel(%arg0: i32, %arg1: memref<2x8x2xf32, #tpu.memory_space<vmem>>, %arg2: memref<2x8x8xf32, #tpu.memory_space<vmem>>, %arg3: memref<2x16xf32, #tpu.memory_space<vmem>>, %arg4: memref<1x16xf32, #tpu.memory_space<vmem>>, %arg5: memref<1x16xf32, #tpu.memory_space<vmem>>, %arg6: memref<2x8x16xf32, #tpu.memory_space<vmem>>) attributes {dimension_semantics = [#tpu.dimension_semantics<parallel>], iteration_bounds = array<i64: 1>, scalar_prefetch = 0 : i64, scratch_operands = 0 : i64, tpu.core_type = #tpu.core_type<tc>, window_params = [{transform_indices = @transform_0, window_bounds = array<i64: 2, 8, 2>}, {transform_indices = @transform_1, window_bounds = array<i64: 2, 8, 8>}, {pipeline_mode = #tpu.pipeline_mode<synchronous>, transform_indices = @transform_2, window_bounds = array<i64: 2, 16>}, {pipeline_mode = #tpu.pipeline_mode<synchronous>, transform_indices = @transform_3, window_bounds = array<i64: 1, 16>}, {pipeline_mode = #tpu.pipeline_mode<synchronous>, transform_indices = @transform_4, window_bounds = array<i64: 1, 16>}, {transform_indices = @transform_5, window_bounds = array<i64: 2, 8, 16>}]} {
    %c0 = arith.constant 0 : index
    %c0_0 = arith.constant 0 : index
    %c0_1 = arith.constant 0 : index
    %0 = vector.load %arg1[%c0, %c0_0, %c0_1] : memref<2x8x2xf32, #tpu.memory_space<vmem>>, vector<2x8x2xf32>
    %c0_2 = arith.constant 0 : index
    %c0_3 = arith.constant 0 : index
    %c0_4 = arith.constant 0 : index
    %1 = vector.load %arg2[%c0_2, %c0_3, %c0_4] : memref<2x8x8xf32, #tpu.memory_space<vmem>>, vector<2x8x8xf32>
    %c0_5 = arith.constant 0 : index
    %c0_6 = arith.constant 0 : index
    %2 = vector.load %arg4[%c0_5, %c0_6] : memref<1x16xf32, #tpu.memory_space<vmem>>, vector<1x16xf32>
    %3 = vector.shape_cast %2 : vector<1x16xf32> to vector<1x1x16xf32>
    %4 = vector.shape_cast %3 : vector<1x1x16xf32> to vector<1x1x16xf32>
    %5 = vector.broadcast %4 : vector<1x1x16xf32> to vector<2x8x16xf32>
    %6 = vector.extract_strided_slice %0 {offsets = [0, 0, 0], sizes = [2, 8, 1], strides = [1, 1, 1]} : vector<2x8x2xf32> to vector<2x8x1xf32>
    %c0_7 = arith.constant 0 : index
    %c0_8 = arith.constant 0 : index
    %7 = vector.load %arg3[%c0_7, %c0_8] : memref<2x16xf32, #tpu.memory_space<vmem>>, vector<1x16xf32>
    %8 = vector.shape_cast %7 : vector<1x16xf32> to vector<1x1x16xf32>
    %9 = vector.broadcast %6 : vector<2x8x1xf32> to vector<2x8x16xf32>
    %10 = vector.broadcast %8 : vector<1x1x16xf32> to vector<2x8x16xf32>
    %11 = arith.mulf %9, %10 : vector<2x8x16xf32>
    %12 = arith.addf %5, %11 : vector<2x8x16xf32>
    %13 = vector.extract_strided_slice %0 {offsets = [0, 0, 1], sizes = [2, 8, 1], strides = [1, 1, 1]} : vector<2x8x2xf32> to vector<2x8x1xf32>
    %c1 = arith.constant 1 : index
    %c0_9 = arith.constant 0 : index
    %14 = vector.load %arg3[%c1, %c0_9] : memref<2x16xf32, #tpu.memory_space<vmem>>, vector<1x16xf32>
    %15 = vector.shape_cast %14 : vector<1x16xf32> to vector<1x1x16xf32>
    %16 = vector.broadcast %13 : vector<2x8x1xf32> to vector<2x8x16xf32>
    %17 = vector.broadcast %15 : vector<1x1x16xf32> to vector<2x8x16xf32>
    %18 = arith.mulf %16, %17 : vector<2x8x16xf32>
    %19 = arith.addf %12, %18 : vector<2x8x16xf32>
    %cst = arith.constant dense<0.000000e+00> : vector<2x8xf32>
    %20 = vector.multi_reduction <add>, %1, %cst [2] : vector<2x8x8xf32> to vector<2x8xf32>
    %21 = vector.shape_cast %20 : vector<2x8xf32> to vector<2x8x1xf32>
    %22 = tpu.reciprocal %21 {approx = true} : vector<2x8x1xf32> -> vector<2x8x1xf32>
    "tpu.trace_start"() <{level = 10 : i32, message = "bnk,bkd->bnd"}> : () -> ()
    %cst_10 = arith.constant dense<0.000000e+00> : vector<2x8x16xf32>
    %23 = tpu.matmul %1, %19, %cst_10 {dimension_numbers = #tpu.dot_dimension_numbers<[2], [1], [1], [2], [0, 0, 0, 1, 1, 2], [0], [0]>} : vector<2x8x8xf32>, vector<2x8x16xf32>, vector<2x8x16xf32> -> vector<2x8x16xf32>
    "tpu.trace_stop"() : () -> ()
    %24 = vector.broadcast %22 : vector<2x8x1xf32> to vector<2x8x16xf32>
    %25 = arith.mulf %23, %24 : vector<2x8x16xf32>
    %c0_11 = arith.constant 0 : index
    %c0_12 = arith.constant 0 : index
    %26 = vector.load %arg5[%c0_11, %c0_12] : memref<1x16xf32, #tpu.memory_space<vmem>>, vector<1x16xf32>
    %27 = vector.shape_cast %26 : vector<1x16xf32> to vector<1x1x16xf32>
    %28 = vector.broadcast %27 : vector<1x1x16xf32> to vector<2x8x16xf32>
    %29 = arith.addf %25, %28 : vector<2x8x16xf32>
    %c0_13 = arith.constant 0 : index
    %c0_14 = arith.constant 0 : index
    %c0_15 = arith.constant 0 : index
    %30 = vector.load %arg6[%c0_13, %c0_14, %c0_15] : memref<2x8x16xf32, #tpu.memory_space<vmem>>, vector<2x8x16xf32>
    tpu.vector_store %arg6[%c0_13, %c0_14, %c0_15], %29 {strides = array<i32>} : memref<2x8x16xf32, #tpu.memory_space<vmem>>, vector<2x8x16xf32>,
    return
  }
  func.func @transform_0(%arg0: i32) -> (i32, i32, i32) {
    %c0_i32 = arith.constant 0 : i32
    %c0_i32_0 = arith.constant 0 : i32
    %c0_i32_1 = arith.constant 0 : i32
    return %arg0, %c0_i32, %c0_i32_0 : i32, i32, i32
  }
  func.func @transform_1(%arg0: i32) -> (i32, i32, i32) {
    %c0_i32 = arith.constant 0 : i32
    %c0_i32_0 = arith.constant 0 : i32
    %c0_i32_1 = arith.constant 0 : i32
    return %arg0, %c0_i32, %c0_i32_0 : i32, i32, i32
  }
  func.func @transform_2(%arg0: i32) -> (i32, i32) {
    %c0_i32 = arith.constant 0 : i32
    %c0_i32_0 = arith.constant 0 : i32
    %c0_i32_1 = arith.constant 0 : i32
    return %c0_i32, %c0_i32_0 : i32, i32
  }
  func.func @transform_3(%arg0: i32) -> (i32, i32) {
    %c0_i32 = arith.constant 0 : i32
    %c0_i32_0 = arith.constant 0 : i32
    %c0_i32_1 = arith.constant 0 : i32
    return %c0_i32, %c0_i32_0 : i32, i32
  }
  func.func @transform_4(%arg0: i32) -> (i32, i32) {
    %c0_i32 = arith.constant 0 : i32
    %c0_i32_0 = arith.constant 0 : i32
    %c0_i32_1 = arith.constant 0 : i32
    return %c0_i32, %c0_i32_0 : i32, i32
  }
  func.func @transform_5(%arg0: i32) -> (i32, i32, i32) {
    %c0_i32 = arith.constant 0 : i32
    %c0_i32_0 = arith.constant 0 : i32
    %c0_i32_1 = arith.constant 0 : i32
    return %arg0, %c0_i32, %c0_i32_0 : i32, i32, i32
  }
}

</mosaic_0001>

<bundles_post_ra>
// kernel: tpu_custom_call.1
= control target key start
LH: loop header
LB: loop body
LE: loop exit
PB: predicated region body
PF: predicated region fallthrough
CT: control target
= control target key end

     0   :  { %v311_v1 = vmov 1   ;;  %v312_v2 = vmov 0   ;;  %s388_s0 = inlined_call_operand.vmem [shape: f32[2,8,2], index: 0, kind: input, shape index: {}]   ;;  %s389_s1 = inlined_call_operand.vmem [shape: f32[2,8,8], index: 1, kind: input, shape index: {}]   ;;  %s390_s2 = inlined_call_operand.vmem [shape: f32[2,16], index: 2, kind: input, shape index: {}]   ;;  %s391_s3 = inlined_call_operand.vmem [shape: f32[1,16], index: 3, kind: input, shape index: {}]   ;;  %s392_s4 = inlined_call_operand.vmem [shape: f32[1,16], index: 4, kind: input, shape index: {}]   ;;  %s393_s5 = inlined_call_operand.hbm [shape: f32[2,8,16], index: 5, kind: output, shape index: {}]  }
   0x1   :  { %v21_v0 = vld [vmem:[%s388_s0] sm:$0xff]  ;;  %281 = vset.pattern.permute.xlu1 %v311_v1  ;;  %280 = vset.pattern.permute.xlu0 %v312_v2 }
   0x2   :  { %10 = vsyncpa [#allocation3], 0  ;;  %53 = vperm.xlu1 %281, %v21_v0   ;;  %35 = vperm.xlu0 %280, %v21_v0   ;;  %v22_v3 = vld [vmem:[%s388_s0 + $0x8] sm:$0xff]  ;;  %v313_v4 = vmov 0.0   ;;  %vm314_vm0 = vmmov 0   ;;  %v23_v5 = vld [vmem:[%s389_s1] sm:$0xff] }
   0x3   :  { %263 = vmatprep.subr.mxu0 %v313_v4  ;;  %268 = vmatprep.subr.mxu1 %v313_v4  ;;  %vm68_vm1 = vcmask 64512   ;;  %v24_v7 = vld [vmem:[%s389_s1 + $0x8] sm:$0xff]  ;;  %v255_v9 = vld [vmem:[%s390_s2 + $0x1] ss:$0 sm:$0xff]  ;;  %v254_v10 = vld [vmem:[%s390_s2] ss:$0 sm:$0xff] }
   0x4   :  { %265 = vmatprep.mubr.msk.f32.mxu0 %vm314_vm0, %v313_v4  ;;  %270 = vmatprep.mubr.msk.f32.mxu1 %vm314_vm0, %v313_v4  ;;  %v69_v6 = vsel %vm68_vm1, %v23_v5, 0.0  ;;  %v72_v8 = vsel %vm68_vm1, %v24_v7, 0.0  ;;  %v253_v12 = vld [vmem:[%s391_s3] ss:$0 sm:$0xff]  ;;  %vm234_vm2 = vcmask 130048   ;;  %s315_s3 = smov [#allocation2]  }
   0x5   :  { %v258_v28 = vld [vmem:[%s392_s4] ss:$0 sm:$0xff]  ;;  %s242_s6 = sshll.u32 %s315_s3, 4  ;;  %s243_s6 = int_to_ptr.vmem [resolvable:$true] %s242_s6 }
   0x6   :  { %57 = vperm.xlu1 %281, %v22_v3   ;;  %40 = vperm.xlu0 %280, %v22_v3   ;;  %s287_s7 = scalar_lea.vmem %s243_s6, 256  ;;  %p292_p1 = scmp.lt.s32.totalorder %s243_s6, %s243_s6 }
   0x7   :  { %p288_p0 = scmp.ne.s32.totalorder %s243_s6, %s287_s7  ;;  %p293_p2 = scmp.lt.s32.totalorder %s287_s7, %s287_s7 }
   0x9   :  { %p294_p3 = por %p293_p2, %p292_p1 }
   0xa   :  { %282 = vset.pattern.permute.xlu0 %v311_v1 }
   0xb   :  { %p295_p4 = pnand %p294_p3, %p288_p0 }
  0x25   :  { %70 = vadd.xlane.f32.xlu0 %v69_v6 }
  0x2a   :  { %73 = vadd.xlane.f32.xlu1 %v72_v8 }
  0x81   :  { %v54_v11 = vpop.permute.xlu1 %53  ;;  %v36_v13 = vpop.permute.xlu0 %35 }
  0x82   :  { %v64_v14 = vmul.f32 %v255_v9, %v54_v11  ;;  %v47_v15 = vmul.f32 %v254_v10, %v36_v13 }
  0x84   :  { %v49_v16 = vadd.f32 %v253_v12, %v47_v15 }
  0x85   :  { %v58_v17 = vpop.permute.xlu1 %57  ;;  %v41_v18 = vpop.permute.xlu0 %40 }
  0x86   :  { %v48_v19 = vmul.f32 %v254_v10, %v41_v18  ;;  %v66_v20 = vadd.f32 %v64_v14, %v49_v16  ;;  %v65_v21 = vmul.f32 %v255_v9, %v58_v17 }
  0x88   :  { %v50_v22 = vadd.f32 %v253_v12, %v48_v19  ;;  %264 = vmatpush3.msra.mxu0 %v66_v20 }
  0x89   :  { %266 = vmatmul.mubr.msk.f32.vlgmr.msra.gmra.mrb[0].mxu0 %vm68_vm1, %v23_v5 }
  0x8a   :  { %v67_v23 = vadd.f32 %v65_v21, %v50_v22 }
  0x8c   :  { %269 = vmatpush3.msra.mxu1 %v67_v23 }
  0x8d   :  { %271 = vmatmul.mubr.msk.f32.vlgmr.msra.gmra.mrb[0].mxu1 %vm68_vm1, %v24_v7 }
  0xb2   :  { %v71_v24 = vpop.xlane.xlu0 %70 }
  0xb3   :  { %283 = vrcp.f32 %v71_v24 }
  0xb7   :  { %v74_v25 = vpop.xlane.xlu1 %73 }
  0xb8   :  { %285 = vrcp.f32 %v74_v25 }
  0xbd   :  { %v284_v26 = vpop.eup %283 }
  0xc2   :  { %v286_v31 = vpop.eup %285 }
 0x15c   :  { %v146_v27 = vpop.f32.mrb[0].mxu0 }
 0x15d   :  { %v223_v29 = vmul.f32 %v284_v26, %v146_v27  ;;  %v267_v30 = vpop.f32.mrb[1].mxu0 }
 0x15f   :  { %v232_v32 = vadd.f32 %v258_v28, %v223_v29 }
 0x160   :  { %v219_v33 = vpop.f32.mrb[0].mxu1 }
 0x161   :  { %235 = vst.msk [vmem:[#allocation2] sm:$0xff] %vm234_vm2, %v232_v32  ;;  %v224_v34 = vmul.f32 %v286_v31, %v219_v33  ;;  %v272_v35 = vpop.f32.mrb[1].mxu1 }
 0x163   :  { %v233_v36 = vadd.f32 %v258_v28, %v224_v34 }
 0x165   :  { %236 = vst.msk [vmem:[#allocation2 + $0x8] sm:$0xff] %vm234_vm2, %v233_v36 }
 0x166   :  { %298 = shalt.err (!%p295_p4)
}
 0x167   :  { %s299_s9 = scalar_lea.hbm %s393_s5, 256 }
 0x168   :  { %p300_p5 = scmp.ne.s32.totalorder %s393_s5, %s299_s9  ;;  %p303_p6 = scmp.lt.u32.totalorder %s299_s9, %s393_s5 }
 0x16a   :  { %p305_p7 = pnand %p303_p6, %p300_p5 }
 0x16c   :  { %308 = shalt.err (!%p305_p7)
}
 0x16d   :  { %s316_s14 = smov 128   ;;  %s317_s15 = smov 8  }
 0x16e   :  { %248 = dma.vmem_to_hbm [thread:$0]  %s243_s6, 256, %s393_s5, [#allocation3], %s316_s14, %s316_s14, %s317_s15  }
 0x16f   :  { %309 = dma.done.wait [#allocation3], 256  }
 0x170   :  { %310 = vsyncadd [#allocation3], 4294967040 }
 0x171   :  { %252 = vsyncpa [#allocation3], 1 }

</bundles_post_ra>
